<compile_context>
chip_gen: v5e
topology: v5e:2x2
jax: 0.10.0
libtpu: 0.0.40
codegen_flags: <defaults>
</compile_context>

<pallas_src>
import jax
import jax.numpy as jnp
from jax.experimental import pallas as pl
from jax.experimental.pallas import tpu as pltpu


# ----------------------------- kernels ------------------------------------- #

def _mm(x, w):
    # (F, tT, K) @ (K, N) -> (F, tT, N), f32 accumulation on the MXU.
    return jax.lax.dot_general(
        x, w, dimension_numbers=(((2,), (0,)), ((), ())),
        preferred_element_type=jnp.float32)


def _shifted(xs):
    """xs_prev[f] = xs[f-1] (zero at f=0); xs_next[f] = xs[f+1] (zero at f=F-1)."""
    F = xs.shape[0]
    if F == 1:
        z = jnp.zeros_like(xs)
        return z, z
    zero = jnp.zeros_like(xs[:1])
    xs_prev = jnp.concatenate([zero, xs[:-1]], axis=0)
    xs_next = jnp.concatenate([xs[1:], zero], axis=0)
    return xs_prev, xs_next


def fusion_kernel_merged(x1_ref, x2_ref, w_ref, b_ref, o_ref):
    # x1_ref, x2_ref : (F, tT, C)   un-duplicated channels
    # w_ref          : (3C, 2C)     folded conv weights, taps stacked along K
    # b_ref          : (1, 1, 2C)   f32 bias
    # o_ref          : (F, tT, C)   output after GLU
    C = o_ref.shape[-1]
    xs = x1_ref[...] + x2_ref[...]                       # fused add (VPU)
    xs_prev, xs_next = _shifted(xs)
    # Tiny "im2col" along F: lane-concat is 128-aligned because C % 128 == 0.
    xs3 = jnp.concatenate([xs_prev, xs, xs_next], axis=-1)      # (F, tT, 3C)
    y = _mm(xs3, w_ref[...]) + b_ref[...]                        # (F, tT, 2C) f32
    a = y[..., :C]                                               # aligned slices
    g = y[..., C:]
    o_ref[...] = (a * jax.nn.sigmoid(g)).astype(o_ref.dtype)    # single store


def fusion_kernel_split(x1_ref, x2_ref, wa_ref, wg_ref, ba_ref, bg_ref, o_ref):
    # wa_ref, wg_ref : (3, C, C)  folded conv weights (GLU value / gate halves)
    # ba_ref, bg_ref : (1, 1, C)  f32 bias halves
    xs = x1_ref[...] + x2_ref[...]
    xs_prev, xs_next = _shifted(xs)
    a = (_mm(xs_prev, wa_ref[0]) + _mm(xs, wa_ref[1])
         + _mm(xs_next, wa_ref[2]) + ba_ref[...])
    g = (_mm(xs_prev, wg_ref[0]) + _mm(xs, wg_ref[1])
         + _mm(xs_next, wg_ref[2]) + bg_ref[...])
    o_ref[...] = (a * jax.nn.sigmoid(g)).astype(o_ref.dtype)    # single store


# --------------------------- tiling helpers --------------------------------- #

def _round_up(x, m):
    return -(-x // m) * m


def _padded_block_bytes(F, tt, C, itemsize):
    # (F, tt, C) block: second-to-last dim pads to 8 sublanes, last to 128 lanes.
    return F * _round_up(tt, 8) * _round_up(C, 128) * itemsize


def _vmem_budget():
    """(vmem_limit_bytes, per-step block budget) derived from the chip's VMEM."""
    try:
        info = pltpu.get_tpu_info()
        cap = int(getattr(info, "vmem_capacity_bytes", 0)) or (64 << 20)
    except Exception:
        cap = 64 << 20                       # conservative default (v7x per-TC)
    vmem_limit = min(int(cap * 0.75), 100 << 20)   # ~48 MiB v7x, ~96 MiB v5e/v6e
    return vmem_limit, int(vmem_limit * 0.6)


def _pick_t_tile(F, T, C, itemsize, fixed_bytes, tmp_blocks, budget_bytes):
    """Largest T tile (a multiple of 8, or full T when T <= 8) whose padded
    per-step footprint fits the budget: 2 inputs + 1 output double-buffered,
    plus an estimate of in-kernel f32 value temporaries, plus weights/biases."""
    def footprint(tt):
        io = 6 * _padded_block_bytes(F, tt, C, itemsize)        # 3 arrays x 2 bufs
        tmp = tmp_blocks * _padded_block_bytes(F, tt, C, 4)     # value temporaries
        return io + tmp + fixed_bytes

    if T <= 8:
        return T
    t_cap = (T // 8) * 8
    best = 8
    for tt in range(8, t_cap + 1, 8):
        if footprint(tt) <= budget_bytes:
            best = tt
    # Prefer an exact divisor of T (no ragged / masked last block) if one exists
    # within a factor of 2 of the largest fitting tile.
    for tt in range(best, max(7, best // 2 - 1), -8):
        if T % tt == 0:
            return tt
    return best
    # TODO(synk): add an F-tiling (1-row halo) fallback for very large F where
    # even t_tile == 8 does not fit the VMEM budget.


# ------------------------------- wrapper ------------------------------------ #

def fusion_layer(x1, x2, weight, bias):
    """x1, x2: (B, F, T, C); weight: (2C, 2C, 3, 1) [OIHW]; bias: (2C,)."""
    B, F, T, C = x1.shape
    assert x2.shape == x1.shape
    assert weight.shape == (2 * C, 2 * C, 3, 1)
    assert bias.shape == (2 * C,)

    # OIHW (2C, 2C, 3, 1) -> (3, 2C_in, 2C_out); cross-correlation, no flip.
    w_t = jnp.transpose(weight[..., 0].astype(jnp.float32), (2, 1, 0))
    # Fold the channel repeat into the weight (in f32, before any cast):
    #   concat([x, x], -1) @ W[k] == x @ (W[k][:C] + W[k][C:])
    w_folded = w_t[:, :C, :] + w_t[:, C:, :]                    # (3, C, 2C)
    # Weights stay low-precision only when the inputs are low precision.
    w_dtype = x1.dtype
    w_isize = jnp.dtype(w_dtype).itemsize
    itemsize = jnp.dtype(x1.dtype).itemsize

    merged = (C % 128 == 0)
    vmem_limit, budget = _vmem_budget()

    if merged:
        # One matmul per block: K = 3C (taps stacked [W0; W1; W2]), N = 2C.
        w3 = jnp.concatenate(
            [w_folded[0], w_folded[1], w_folded[2]], axis=0).astype(w_dtype)
        b3 = bias.reshape(1, 1, 2 * C).astype(jnp.float32)
        fixed_bytes = (2 * _round_up(3 * C, 8) * _round_up(2 * C, 128) * w_isize
                       + 2 * 8 * _round_up(2 * C, 128) * 4)
        tmp_blocks = 10              # xs + prev + next + xs3(3) + y(2) + GLU temps
    else:
        # Pre-split GLU halves so the kernel never slices the lane dim off-128.
        w_a = w_folded[:, :, :C].astype(w_dtype)                # (3, C, C) value
        w_g = w_folded[:, :, C:].astype(w_dtype)                # (3, C, C) gate
        b_a = bias[:C].reshape(1, 1, C).astype(jnp.float32)
        b_g = bias[C:].reshape(1, 1, C).astype(jnp.float32)
        fixed_bytes = (4 * 3 * _round_up(C, 8) * _round_up(C, 128) * w_isize
                       + 4 * 8 * _round_up(C, 128) * 4)
        tmp_blocks = 8
        # TODO(synk): for production C < 128 a lane-dense relayout (T*C in lanes,
        # VPU contraction) would avoid the 128/C DMA+store inflation.

    t_tile = _pick_t_tile(F, T, C, itemsize, fixed_bytes, tmp_blocks, budget)

    # Keep both TensorCores busy on 2-TC parts (v7x): need >= 2 parallel steps.
    if B * pl.cdiv(T, t_tile) < 2 and T > 8 and t_tile > 8:
        t_tile = max(8, _round_up(t_tile // 2, 8))

    grid = (B, pl.cdiv(T, t_tile))

    x_spec = pl.BlockSpec((None, F, t_tile, C), lambda b, t: (b, 0, t, 0))
    o_spec = pl.BlockSpec((None, F, t_tile, C), lambda b, t: (b, 0, t, 0))

    if merged:
        kernel = fusion_kernel_merged
        in_specs = [x_spec, x_spec,
                    pl.BlockSpec((3 * C, 2 * C), lambda b, t: (0, 0)),
                    pl.BlockSpec((1, 1, 2 * C), lambda b, t: (0, 0, 0))]
        operands = (x1, x2, w3, b3)
    else:
        kernel = fusion_kernel_split
        in_specs = [x_spec, x_spec,
                    pl.BlockSpec((3, C, C), lambda b, t: (0, 0, 0)),
                    pl.BlockSpec((3, C, C), lambda b, t: (0, 0, 0)),
                    pl.BlockSpec((1, 1, C), lambda b, t: (0, 0, 0)),
                    pl.BlockSpec((1, 1, C), lambda b, t: (0, 0, 0))]
        operands = (x1, x2, w_a, w_g, b_a, b_g)

    return pl.pallas_call(
        kernel,
        out_shape=jax.ShapeDtypeStruct((B, F, T, C), x1.dtype),
        grid_spec=pltpu.PrefetchScalarGridSpec(
            num_scalar_prefetch=0,
            grid=grid,
            in_specs=in_specs,
            out_specs=o_spec,
        ),
        compiler_params=pltpu.CompilerParams(
            dimension_semantics=("parallel", "parallel"),
            vmem_limit_bytes=vmem_limit),
    )(*operands)


# ------------------------------ reference ----------------------------------- #

def fusion_layer_reference(x1, x2, weight, bias):
    """Pure-JAX reference matching the PyTorch forward exactly."""
    x = x1 + x2
    x = jnp.concatenate([x, x], axis=-1)                    # (B,F,T,2C)
    x_nchw = jnp.transpose(x, (0, 3, 1, 2))                 # (B,2C,F,T)
    y = jax.lax.conv_general_dilated(
        x_nchw, weight, window_strides=(1, 1),
        padding=((1, 1), (0, 0)),
        dimension_numbers=("NCHW", "OIHW", "NCHW"),
        precision=jax.lax.Precision.HIGHEST)
    y = y + bias[None, :, None, None]
    y = jnp.transpose(y, (0, 2, 3, 1))                      # (B,F,T,2C)
    a, g = jnp.split(y, 2, axis=-1)
    return a * jax.nn.sigmoid(g)


# --------------------------------- test ------------------------------------- #

if __name__ == "__main__":
    base_key = jax.random.PRNGKey(0)

    def run_case(case_idx, B, F, T, C):
        key = jax.random.fold_in(base_key, case_idx)
        k1, k2, kw, kb = jax.random.split(key, 4)
        x1 = jax.random.normal(k1, (B, F, T, C), dtype=jnp.float32)
        x2 = jax.random.normal(k2, (B, F, T, C), dtype=jnp.float32)
        # Conv2d(input_dim*2, input_dim*2, kernel=(3,1)) parameters (OIHW).
        weight = 0.1 * jax.random.normal(kw, (2 * C, 2 * C, 3, 1),
                                         dtype=jnp.float32)
        bias = 0.1 * jax.random.normal(kb, (2 * C,), dtype=jnp.float32)

        out = jax.block_until_ready(fusion_layer(x1, x2, weight, bias))
        ref = fusion_layer_reference(x1, x2, weight, bias)
        assert out.shape == (B, F, T, C), out.shape
        err = float(jnp.abs(out - ref).max())
        assert jnp.allclose(out, ref, atol=3e-4, rtol=3e-4), err

    run_case(0, B=2, F=16, T=8, C=8)      # small-C split path
    run_case(1, B=1, F=8, T=16, C=128)    # lane-dense merged (single-matmul) path
    print("KERNEL_OK")
</pallas_src>

<mosaic_0001>
module attributes {stable_mosaic.version = 11 : i64} {
  func.func @fusion_kernel_split(%arg0: i32, %arg1: i32, %arg2: memref<1x16x8x8xf32, #tpu.memory_space<vmem>>, %arg3: memref<1x16x8x8xf32, #tpu.memory_space<vmem>>, %arg4: memref<3x8x8xf32, #tpu.memory_space<vmem>>, %arg5: memref<3x8x8xf32, #tpu.memory_space<vmem>>, %arg6: memref<1x1x8xf32, #tpu.memory_space<vmem>>, %arg7: memref<1x1x8xf32, #tpu.memory_space<vmem>>, %arg8: memref<1x16x8x8xf32, #tpu.memory_space<vmem>>) attributes {dimension_semantics = [#tpu.dimension_semantics<parallel>, #tpu.dimension_semantics<parallel>], iteration_bounds = array<i64: 2, 1>, scalar_prefetch = 0 : i64, scratch_operands = 0 : i64, tpu.core_type = #tpu.core_type<tc>, window_params = [{transform_indices = @transform_0, window_bounds = array<i64: 1, 16, 8, 8>}, {transform_indices = @transform_1, window_bounds = array<i64: 1, 16, 8, 8>}, {pipeline_mode = #tpu.pipeline_mode<synchronous>, transform_indices = @transform_2, window_bounds = array<i64: 3, 8, 8>}, {pipeline_mode = #tpu.pipeline_mode<synchronous>, transform_indices = @transform_3, window_bounds = array<i64: 3, 8, 8>}, {pipeline_mode = #tpu.pipeline_mode<synchronous>, transform_indices = @transform_4, window_bounds = array<i64: 1, 1, 8>}, {pipeline_mode = #tpu.pipeline_mode<synchronous>, transform_indices = @transform_5, window_bounds = array<i64: 1, 1, 8>}, {transform_indices = @transform_6, window_bounds = array<i64: 1, 16, 8, 8>}]} {
    %c0 = arith.constant 0 : index
    %c0_0 = arith.constant 0 : index
    %c0_1 = arith.constant 0 : index
    %c0_2 = arith.constant 0 : index
    %0 = vector.load %arg2[%c0, %c0_0, %c0_1, %c0_2] : memref<1x16x8x8xf32, #tpu.memory_space<vmem>>, vector<1x16x8x8xf32>
    %1 = vector.shape_cast %0 : vector<1x16x8x8xf32> to vector<16x8x8xf32>
    %c0_3 = arith.constant 0 : index
    %c0_4 = arith.constant 0 : index
    %c0_5 = arith.constant 0 : index
    %c0_6 = arith.constant 0 : index
    %2 = vector.load %arg3[%c0_3, %c0_4, %c0_5, %c0_6] : memref<1x16x8x8xf32, #tpu.memory_space<vmem>>, vector<1x16x8x8xf32>
    %3 = vector.shape_cast %2 : vector<1x16x8x8xf32> to vector<16x8x8xf32>
    %4 = arith.addf %1, %3 : vector<16x8x8xf32>
    %cst = arith.constant 0.000000e+00 : f32
    %5 = vector.broadcast %cst : f32 to vector<1x8x8xf32>
    %6 = vector.extract_strided_slice %4 {offsets = [0, 0, 0], sizes = [15, 8, 8], strides = [1, 1, 1]} : vector<16x8x8xf32> to vector<15x8x8xf32>
    %7 = tpu.concatenate %5, %6 in 0 : vector<1x8x8xf32>, vector<15x8x8xf32> -> vector<16x8x8xf32>
    %8 = vector.extract_strided_slice %4 {offsets = [1, 0, 0], sizes = [15, 8, 8], strides = [1, 1, 1]} : vector<16x8x8xf32> to vector<15x8x8xf32>
    %9 = tpu.concatenate %8, %5 in 0 : vector<15x8x8xf32>, vector<1x8x8xf32> -> vector<16x8x8xf32>
    %c0_7 = arith.constant 0 : index
    %c0_8 = arith.constant 0 : index
    %c0_9 = arith.constant 0 : index
    %10 = vector.load %arg4[%c0_7, %c0_8, %c0_9] : memref<3x8x8xf32, #tpu.memory_space<vmem>>, vector<1x8x8xf32>
    %11 = vector.shape_cast %10 : vector<1x8x8xf32> to vector<8x8xf32>
    %cst_10 = arith.constant dense<0.000000e+00> : vector<16x8x8xf32>
    %12 = tpu.matmul %7, %11, %cst_10 {dimension_numbers = #tpu.dot_dimension_numbers<[2], [0], [0, 1], [1], [0, 0, 0, 1, 1, 1], [], []>} : vector<16x8x8xf32>, vector<8x8xf32>, vector<16x8x8xf32> -> vector<16x8x8xf32>
    %c1 = arith.constant 1 : index
    %c0_11 = arith.constant 0 : index
    %c0_12 = arith.constant 0 : index
    %13 = vector.load %arg4[%c1, %c0_11, %c0_12] : memref<3x8x8xf32, #tpu.memory_space<vmem>>, vector<1x8x8xf32>
    %14 = vector.shape_cast %13 : vector<1x8x8xf32> to vector<8x8xf32>
    %cst_13 = arith.constant dense<0.000000e+00> : vector<16x8x8xf32>
    %15 = tpu.matmul %4, %14, %cst_13 {dimension_numbers = #tpu.dot_dimension_numbers<[2], [0], [0, 1], [1], [0, 0, 0, 1, 1, 1], [], []>} : vector<16x8x8xf32>, vector<8x8xf32>, vector<16x8x8xf32> -> vector<16x8x8xf32>
    %16 = arith.addf %12, %15 : vector<16x8x8xf32>
    %c2 = arith.constant 2 : index
    %c0_14 = arith.constant 0 : index
    %c0_15 = arith.constant 0 : index
    %17 = vector.load %arg4[%c2, %c0_14, %c0_15] : memref<3x8x8xf32, #tpu.memory_space<vmem>>, vector<1x8x8xf32>
    %18 = vector.shape_cast %17 : vector<1x8x8xf32> to vector<8x8xf32>
    %cst_16 = arith.constant dense<0.000000e+00> : vector<16x8x8xf32>
    %19 = tpu.matmul %9, %18, %cst_16 {dimension_numbers = #tpu.dot_dimension_numbers<[2], [0], [0, 1], [1], [0, 0, 0, 1, 1, 1], [], []>} : vector<16x8x8xf32>, vector<8x8xf32>, vector<16x8x8xf32> -> vector<16x8x8xf32>
    %20 = arith.addf %16, %19 : vector<16x8x8xf32>
    %c0_17 = arith.constant 0 : index
    %c0_18 = arith.constant 0 : index
    %c0_19 = arith.constant 0 : index
    %21 = vector.load %arg6[%c0_17, %c0_18, %c0_19] : memref<1x1x8xf32, #tpu.memory_space<vmem>>, vector<1x1x8xf32>
    %22 = vector.broadcast %21 : vector<1x1x8xf32> to vector<16x8x8xf32>
    %23 = arith.addf %20, %22 : vector<16x8x8xf32>
    %c0_20 = arith.constant 0 : index
    %c0_21 = arith.constant 0 : index
    %c0_22 = arith.constant 0 : index
    %24 = vector.load %arg5[%c0_20, %c0_21, %c0_22] : memref<3x8x8xf32, #tpu.memory_space<vmem>>, vector<1x8x8xf32>
    %25 = vector.shape_cast %24 : vector<1x8x8xf32> to vector<8x8xf32>
    %cst_23 = arith.constant dense<0.000000e+00> : vector<16x8x8xf32>
    %26 = tpu.matmul %7, %25, %cst_23 {dimension_numbers = #tpu.dot_dimension_numbers<[2], [0], [0, 1], [1], [0, 0, 0, 1, 1, 1], [], []>} : vector<16x8x8xf32>, vector<8x8xf32>, vector<16x8x8xf32> -> vector<16x8x8xf32>
    %c1_24 = arith.constant 1 : index
    %c0_25 = arith.constant 0 : index
    %c0_26 = arith.constant 0 : index
    %27 = vector.load %arg5[%c1_24, %c0_25, %c0_26] : memref<3x8x8xf32, #tpu.memory_space<vmem>>, vector<1x8x8xf32>
    %28 = vector.shape_cast %27 : vector<1x8x8xf32> to vector<8x8xf32>
    %cst_27 = arith.constant dense<0.000000e+00> : vector<16x8x8xf32>
    %29 = tpu.matmul %4, %28, %cst_27 {dimension_numbers = #tpu.dot_dimension_numbers<[2], [0], [0, 1], [1], [0, 0, 0, 1, 1, 1], [], []>} : vector<16x8x8xf32>, vector<8x8xf32>, vector<16x8x8xf32> -> vector<16x8x8xf32>
    %30 = arith.addf %26, %29 : vector<16x8x8xf32>
    %c2_28 = arith.constant 2 : index
    %c0_29 = arith.constant 0 : index
    %c0_30 = arith.constant 0 : index
    %31 = vector.load %arg5[%c2_28, %c0_29, %c0_30] : memref<3x8x8xf32, #tpu.memory_space<vmem>>, vector<1x8x8xf32>
    %32 = vector.shape_cast %31 : vector<1x8x8xf32> to vector<8x8xf32>
    %cst_31 = arith.constant dense<0.000000e+00> : vector<16x8x8xf32>
    %33 = tpu.matmul %9, %32, %cst_31 {dimension_numbers = #tpu.dot_dimension_numbers<[2], [0], [0, 1], [1], [0, 0, 0, 1, 1, 1], [], []>} : vector<16x8x8xf32>, vector<8x8xf32>, vector<16x8x8xf32> -> vector<16x8x8xf32>
    %34 = arith.addf %30, %33 : vector<16x8x8xf32>
    %c0_32 = arith.constant 0 : index
    %c0_33 = arith.constant 0 : index
    %c0_34 = arith.constant 0 : index
    %35 = vector.load %arg7[%c0_32, %c0_33, %c0_34] : memref<1x1x8xf32, #tpu.memory_space<vmem>>, vector<1x1x8xf32>
    %36 = vector.broadcast %35 : vector<1x1x8xf32> to vector<16x8x8xf32>
    %37 = arith.addf %34, %36 : vector<16x8x8xf32>
    %38 = arith.negf %37 : vector<16x8x8xf32>
    %39 = math.exp %38 : vector<16x8x8xf32>
    %cst_35 = arith.constant 1.000000e+00 : f32
    %40 = vector.broadcast %cst_35 : f32 to vector<16x8x8xf32>
    %41 = arith.addf %40, %39 : vector<16x8x8xf32>
    %42 = arith.divf %40, %41 : vector<16x8x8xf32>
    %43 = arith.mulf %23, %42 : vector<16x8x8xf32>
    %c0_36 = arith.constant 0 : index
    %c0_37 = arith.constant 0 : index
    %c0_38 = arith.constant 0 : index
    %c0_39 = arith.constant 0 : index
    %44 = vector.load %arg8[%c0_36, %c0_37, %c0_38, %c0_39] : memref<1x16x8x8xf32, #tpu.memory_space<vmem>>, vector<1x16x8x8xf32>
    %45 = vector.shape_cast %44 : vector<1x16x8x8xf32> to vector<16x8x8xf32>
    %46 = vector.shape_cast %43 : vector<16x8x8xf32> to vector<1x16x8x8xf32>
    tpu.vector_store %arg8[%c0_36, %c0_37, %c0_38, %c0_39], %46 {strides = array<i32>} : memref<1x16x8x8xf32, #tpu.memory_space<vmem>>, vector<1x16x8x8xf32>,
    return
  }
  func.func @transform_0(%arg0: i32, %arg1: i32) -> (i32, i32, i32, i32) {
    %c0_i32 = arith.constant 0 : i32
    %c0_i32_0 = arith.constant 0 : i32
    %c0_i32_1 = arith.constant 0 : i32
    return %arg0, %c0_i32, %arg1, %c0_i32_0 : i32, i32, i32, i32
  }
  func.func @transform_1(%arg0: i32, %arg1: i32) -> (i32, i32, i32, i32) {
    %c0_i32 = arith.constant 0 : i32
    %c0_i32_0 = arith.constant 0 : i32
    %c0_i32_1 = arith.constant 0 : i32
    return %arg0, %c0_i32, %arg1, %c0_i32_0 : i32, i32, i32, i32
  }
  func.func @transform_2(%arg0: i32, %arg1: i32) -> (i32, i32, i32) {
    %c0_i32 = arith.constant 0 : i32
    %c0_i32_0 = arith.constant 0 : i32
    %c0_i32_1 = arith.constant 0 : i32
    %c0_i32_2 = arith.constant 0 : i32
    return %c0_i32, %c0_i32_0, %c0_i32_1 : i32, i32, i32
  }
  func.func @transform_3(%arg0: i32, %arg1: i32) -> (i32, i32, i32) {
    %c0_i32 = arith.constant 0 : i32
    %c0_i32_0 = arith.constant 0 : i32
    %c0_i32_1 = arith.constant 0 : i32
    %c0_i32_2 = arith.constant 0 : i32
    return %c0_i32, %c0_i32_0, %c0_i32_1 : i32, i32, i32
  }
  func.func @transform_4(%arg0: i32, %arg1: i32) -> (i32, i32, i32) {
    %c0_i32 = arith.constant 0 : i32
    %c0_i32_0 = arith.constant 0 : i32
    %c0_i32_1 = arith.constant 0 : i32
    %c0_i32_2 = arith.constant 0 : i32
    return %c0_i32, %c0_i32_0, %c0_i32_1 : i32, i32, i32
  }
  func.func @transform_5(%arg0: i32, %arg1: i32) -> (i32, i32, i32) {
    %c0_i32 = arith.constant 0 : i32
    %c0_i32_0 = arith.constant 0 : i32
    %c0_i32_1 = arith.constant 0 : i32
    %c0_i32_2 = arith.constant 0 : i32
    return %c0_i32, %c0_i32_0, %c0_i32_1 : i32, i32, i32
  }
  func.func @transform_6(%arg0: i32, %arg1: i32) -> (i32, i32, i32, i32) {
    %c0_i32 = arith.constant 0 : i32
    %c0_i32_0 = arith.constant 0 : i32
    %c0_i32_1 = arith.constant 0 : i32
    return %arg0, %c0_i32, %arg1, %c0_i32_0 : i32, i32, i32, i32
  }
}

</mosaic_0001>

<bundles_post_ra>
// kernel: tpu_custom_call.1
= control target key start
LH: loop header
LB: loop body
LE: loop exit
PB: predicated region body
PF: predicated region fallthrough
CT: control target
= control target key end

     0   :  { %s1604_s21 = smov 0   ;;  %s1606_s22 = smov 0   ;;  %s2071_s0 = inlined_call_operand.vmem [shape: f32[2,16,8,8], index: 0, kind: input, shape index: {}]   ;;  %s2072_s1 = inlined_call_operand.vmem [shape: f32[2,16,8,8], index: 1, kind: input, shape index: {}]   ;;  %s2073_s2 = inlined_call_operand.vmem [shape: f32[3,8,8], index: 2, kind: input, shape index: {}]   ;;  %s2074_s3 = inlined_call_operand.vmem [shape: f32[3,8,8], index: 3, kind: input, shape index: {}]   ;;  %s2075_s4 = inlined_call_operand.vmem [shape: f32[1,1,8], index: 4, kind: input, shape index: {}]   ;;  %s2076_s5 = inlined_call_operand.vmem [shape: f32[1,1,8], index: 5, kind: input, shape index: {}]   ;;  %s2077_s6 = inlined_call_operand.vmem [shape: f32[2,16,8,8], index: 6, kind: output, shape index: {}]  }
   0x1   :  { %s1608_s23 = smov 0  }
   0x2 LB: > { %s28_s24 = sadd.s32 1, %s1562_s22  ;;  %p1327_p0 = scmp.ge.s32.totalorder %s1566_s23, 1  ;;  %s1566_s23 = sphi %s1608_s23, %s16_s23   ;;  %s1562_s22 = sphi %s1606_s22, %s2079_s22   ;;  %s1558_s21 = sphi %s1604_s21, %s2078_s21  }
   0x3   : > { %p30_p1 = scmp.ge.s32.totalorder %s28_s24, 2  ;;  %p246_p2 = scmp.lt.s32.totalorder %s1566_s23, 3 }
   0x5   : > { %s2081_s24 = smov (%p30_p1, %s28_s24), 0  ;;  %p247_p3 = pnand %p1327_p0, %p246_p2 }
   0x6   : > { %p290_p4 = scmp.lt.s32.totalorder (!%p247_p3), %s1558_s21, 1 }
   0x7   : > { %250 = sbr.rel (%p247_p3) target bundleno = 372 (0x174), region = 44 }
   0xc   : > { %v1334_v0 = vld [vmem:[%s2073_s2 + $0x8] sm:$0xff]  ;;  %v362_v1 = vld [vmem:[%s2073_s2] sm:$0xff]  ;;  %s2083_s21 = smov (!%p290_p4, %s1558_s21), 1  ;;  %v1414_v4 = vld [vmem:[%s2074_s3 + $0x10] sm:$0xff]  ;;  %v1568_v6 = vmov 0.0   ;;  %vm365_vm0 = vcmask 64512  }
   0xd   : > { %v1382_v2 = vld [vmem:[%s2074_s3 + $0x8] sm:$0xff]  ;;  %1451 = vmatpush.msra.mxu2 %v1334_v0  ;;  %1452 = vmatpush.msra.mxu3 %v362_v1  ;;  %v650_v3 = vld [vmem:[%s2074_s3] sm:$0xff]  ;;  %v1366_v5 = vld [vmem:[%s2073_s2 + $0x10] sm:$0xff]  ;;  %s1640_s13 = sshll.u32 %s2083_s21, 7 }
   0xe   : > { %429 = vmatpush.msra.mxu0 %v1334_v0  ;;  %497 = vmatpush.msra.mxu1 %v362_v1  ;;  %s1647_s16 = scalar_lea.vmem %s2071_s0, %s1640_s13  ;;  %s1653_s19 = scalar_lea.vmem %s2072_s1, %s1640_s13 }
   0xf   : > { %668 = vmatpush.msrb.mxu3 %v1382_v2  ;;  %498 = vmatmul.f32.vlgmr.msra.gmra.mxu1 %v1568_v6  ;;  %v322_v7 = vld [vmem:[%s1647_s16 + $0x40] sm:$0xff]  ;;  %v321_v9 = vld [vmem:[%s1647_s16 + $0x38] sm:$0xff]  ;;  %v323_v16 = vld [vmem:[%s1647_s16 + $0x48] sm:$0xff]  ;;  %s1932_s29 = scalar_lea.vmem %s2077_s6, %s1640_s13 }
  0x10   : > { %733 = vmatpush.msrb.mxu0 %v650_v3  ;;  %564 = vmatpush.msrb.mxu2 %v1366_v5  ;;  %v338_v8 = vld [vmem:[%s1653_s19 + $0x40] sm:$0xff]  ;;  %v337_v11 = vld [vmem:[%s1653_s19 + $0x38] sm:$0xff]  ;;  %v339_v17 = vld [vmem:[%s1653_s19 + $0x48] sm:$0xff] }
  0x11   : > { %800 = vmatpush.msrb.mxu1 %v1414_v4  ;;  %v1658_v10 = vadd.f32 %v338_v8, %v322_v7  ;;  %v314_v12 = vld [vmem:[%s1647_s16] sm:$0xff]  ;;  %v1663_v14 = vadd.f32 %v337_v11, %v321_v9  ;;  %v315_v18 = vld [vmem:[%s1647_s16 + $0x8] sm:$0xff]  ;;  %v1679_v20 = vadd.f32 %v339_v17, %v323_v16  ;;  %v324_v22 = vld [vmem:[%s1647_s16 + $0x50] sm:$0xff] }
  0x12   : > { %v330_v13 = vld [vmem:[%s1653_s19] sm:$0xff]  ;;  %v331_v19 = vld [vmem:[%s1653_s19 + $0x8] sm:$0xff]  ;;  %v340_v23 = vld [vmem:[%s1653_s19 + $0x50] sm:$0xff] }
  0x13   : > { %v1665_v15 = vadd.f32 %v330_v13, %v314_v12  ;;  %1343 = vmatmul.msk.f32.vlgmr.msra.gmra.mxu2 %vm365_vm0, %v1658_v10  ;;  %1358 = vmatmul.msk.f32.vlgmr.msra.gmra.mxu3 %vm365_vm0, %v1663_v14  ;;  %v1681_v21 = vadd.f32 %v331_v19, %v315_v18  ;;  %v316_v24 = vld [vmem:[%s1647_s16 + $0x10] sm:$0xff]  ;;  %v1695_v26 = vadd.f32 %v340_v23, %v324_v22  ;;  %v325_v28 = vld [vmem:[%s1647_s16 + $0x58] sm:$0xff]  ;;  %v326_v34 = vld [vmem:[%s1647_s16 + $0x60] sm:$0xff] }
  0x14   : > { %v332_v25 = vld [vmem:[%s1653_s19 + $0x10] sm:$0xff]  ;;  %v341_v29 = vld [vmem:[%s1653_s19 + $0x58] sm:$0xff]  ;;  %v342_v35 = vld [vmem:[%s1653_s19 + $0x60] sm:$0xff] }
  0x15   : > { %1335 = vmatmul.msk.f32.vlgmr.msra.gmra.mxu0 %vm365_vm0, %v1665_v15  ;;  %v1697_v27 = vadd.f32 %v332_v25, %v316_v24  ;;  %v317_v30 = vld [vmem:[%s1647_s16 + $0x18] sm:$0xff]  ;;  %v1711_v32 = vadd.f32 %v341_v29, %v325_v28  ;;  %v318_v36 = vld [vmem:[%s1647_s16 + $0x20] sm:$0xff]  ;;  %v1723_v38 = vadd.f32 %v342_v35, %v326_v34  ;;  %v327_v40 = vld [vmem:[%s1647_s16 + $0x68] sm:$0xff] }
  0x16   : > { %v333_v31 = vld [vmem:[%s1653_s19 + $0x18] sm:$0xff]  ;;  %v334_v37 = vld [vmem:[%s1653_s19 + $0x20] sm:$0xff]  ;;  %v343_v41 = vld [vmem:[%s1653_s19 + $0x68] sm:$0xff] }
  0x17   : > { %1351 = vmatmul.msk.f32.gmra.mxu1 %vm365_vm0, %v1665_v15  ;;  %v349_v33 = vadd.f32 %v333_v31, %v317_v30  ;;  %v350_v39 = vadd.f32 %v334_v37, %v318_v36  ;;  %v319_v42 = vld [vmem:[%s1647_s16 + $0x28] sm:$0xff]  ;;  %v1735_v44 = vadd.f32 %v343_v41, %v327_v40  ;;  %v328_v46 = vld [vmem:[%s1647_s16 + $0x70] sm:$0xff]  ;;  %v329_v52 = vld [vmem:[%s1647_s16 + $0x78] sm:$0xff] }
  0x18   : > { %v335_v43 = vld [vmem:[%s1653_s19 + $0x28] sm:$0xff]  ;;  %v344_v47 = vld [vmem:[%s1653_s19 + $0x70] sm:$0xff]  ;;  %v345_v53 = vld [vmem:[%s1653_s19 + $0x78] sm:$0xff] }
  0x19   : > { %v351_v45 = vadd.f32 %v335_v43, %v319_v42  ;;  %v320_v48 = vld [vmem:[%s1647_s16 + $0x30] sm:$0xff]  ;;  %v1747_v50 = vadd.f32 %v344_v47, %v328_v46  ;;  %v1757_v54 = vadd.f32 %v345_v53, %v329_v52 }
  0x1a   : > { %v336_v49 = vld [vmem:[%s1653_s19 + $0x30] sm:$0xff] }
  0x1b   : > { %1344 = vmatmul.msk.f32.gmra.mxu2 %vm365_vm0, %v1679_v20  ;;  %1359 = vmatmul.msk.f32.gmra.mxu3 %vm365_vm0, %v1658_v10  ;;  %v352_v51 = vadd.f32 %v336_v49, %v320_v48 }
  0x1d   : > { %1336 = vmatmul.msk.f32.gmra.mxu0 %vm365_vm0, %v1681_v21 }
  0x1f   : > { %1352 = vmatmul.msk.f32.gmra.mxu1 %vm365_vm0, %v1681_v21 }
  0x23   : > { %1345 = vmatmul.msk.f32.gmra.mxu2 %vm365_vm0, %v1695_v26  ;;  %1360 = vmatmul.msk.f32.gmra.mxu3 %vm365_vm0, %v1679_v20 }
  0x25   : > { %1337 = vmatmul.msk.f32.gmra.mxu0 %vm365_vm0, %v1697_v27 }
  0x27   : > { %1353 = vmatmul.msk.f32.gmra.mxu1 %vm365_vm0, %v1697_v27 }
  0x2b   : > { %1346 = vmatmul.msk.f32.gmra.mxu2 %vm365_vm0, %v1711_v32  ;;  %1361 = vmatmul.msk.f32.gmra.mxu3 %vm365_vm0, %v1695_v26 }
  0x2d   : > { %1338 = vmatmul.msk.f32.gmra.mxu0 %vm365_vm0, %v349_v33 }
  0x2f   : > { %1354 = vmatmul.msk.f32.gmra.mxu1 %vm365_vm0, %v349_v33 }
  0x33   : > { %1347 = vmatmul.msk.f32.gmra.mxu2 %vm365_vm0, %v1723_v38  ;;  %1362 = vmatmul.msk.f32.gmra.mxu3 %vm365_vm0, %v1711_v32 }
  0x35   : > { %1339 = vmatmul.msk.f32.gmra.mxu0 %vm365_vm0, %v350_v39 }
  0x37   : > { %1355 = vmatmul.msk.f32.gmra.mxu1 %vm365_vm0, %v350_v39 }
  0x3b   : > { %1348 = vmatmul.msk.f32.gmra.mxu2 %vm365_vm0, %v1735_v44  ;;  %1363 = vmatmul.msk.f32.gmra.mxu3 %vm365_vm0, %v1723_v38 }
  0x3d   : > { %1340 = vmatmul.msk.f32.gmra.mxu0 %vm365_vm0, %v351_v45 }
  0x3f   : > { %1356 = vmatmul.msk.f32.gmra.mxu1 %vm365_vm0, %v351_v45 }
  0x43   : > { %1349 = vmatmul.msk.f32.gmra.mxu2 %vm365_vm0, %v1747_v50  ;;  %1364 = vmatmul.msk.f32.gmra.mxu3 %vm365_vm0, %v1735_v44 }
  0x45   : > { %1341 = vmatmul.msk.f32.gmra.mxu0 %vm365_vm0, %v352_v51 }
  0x47   : > { %1357 = vmatmul.msk.f32.gmra.mxu1 %vm365_vm0, %v352_v51 }
  0x4b   : > { %1350 = vmatmul.msk.f32.gmra.mxu2 %vm365_vm0, %v1757_v54  ;;  %1365 = vmatmul.msk.f32.gmra.mxu3 %vm365_vm0, %v1747_v50 }
  0x4d   : > { %1342 = vmatmul.msk.f32.gmra.mxu0 %vm365_vm0, %v1663_v14 }
  0x4f   : > { %1415 = vmatmul.msk.f32.vlgmr.msrb.gmra.mxu1 %vm365_vm0, %v1681_v21 }
  0x53   : > { %1367 = vmatmul.msk.f32.vlgmr.msrb.gmra.mxu2 %vm365_vm0, %v1681_v21  ;;  %1383 = vmatmul.msk.f32.vlgmr.msrb.gmra.mxu3 %vm365_vm0, %v1665_v15 }
  0x55   : > { %734 = vmatmul.f32.vlgmr.msrb.gmra.mxu0 %v1568_v6 }
  0x57   : > { %1416 = vmatmul.msk.f32.gmra.mxu1 %vm365_vm0, %v1697_v27 }
  0x5b   : > { %1368 = vmatmul.msk.f32.gmra.mxu2 %vm365_vm0, %v1697_v27  ;;  %1384 = vmatmul.msk.f32.gmra.mxu3 %vm365_vm0, %v1681_v21 }
  0x5d   : > { %1399 = vmatmul.msk.f32.gmra.mxu0 %vm365_vm0, %v1665_v15 }
  0x5f   : > { %1417 = vmatmul.msk.f32.gmra.mxu1 %vm365_vm0, %v349_v33 }
  0x63   : > { %1369 = vmatmul.msk.f32.gmra.mxu2 %vm365_vm0, %v349_v33  ;;  %1385 = vmatmul.msk.f32.gmra.mxu3 %vm365_vm0, %v1697_v27 }
  0x65   : > { %1400 = vmatmul.msk.f32.gmra.mxu0 %vm365_vm0, %v1681_v21 }
  0x67   : > { %1418 = vmatmul.msk.f32.gmra.mxu1 %vm365_vm0, %v350_v39 }
  0x6b   : > { %1370 = vmatmul.msk.f32.gmra.mxu2 %vm365_vm0, %v350_v39  ;;  %1386 = vmatmul.msk.f32.gmra.mxu3 %vm365_vm0, %v349_v33 }
  0x6d   : > { %1401 = vmatmul.msk.f32.gmra.mxu0 %vm365_vm0, %v1697_v27 }
  0x6f   : > { %1419 = vmatmul.msk.f32.gmra.mxu1 %vm365_vm0, %v351_v45 }
  0x73   : > { %1371 = vmatmul.msk.f32.gmra.mxu2 %vm365_vm0, %v351_v45  ;;  %1387 = vmatmul.msk.f32.gmra.mxu3 %vm365_vm0, %v350_v39 }
  0x75   : > { %1402 = vmatmul.msk.f32.gmra.mxu0 %vm365_vm0, %v349_v33 }
  0x77   : > { %1420 = vmatmul.msk.f32.gmra.mxu1 %vm365_vm0, %v352_v51 }
  0x7b   : > { %1372 = vmatmul.msk.f32.gmra.mxu2 %vm365_vm0, %v352_v51  ;;  %1388 = vmatmul.msk.f32.gmra.mxu3 %vm365_vm0, %v351_v45 }
  0x7d   : > { %1403 = vmatmul.msk.f32.gmra.mxu0 %vm365_vm0, %v350_v39 }
  0x7f   : > { %1421 = vmatmul.msk.f32.gmra.mxu1 %vm365_vm0, %v1663_v14 }
  0x83   : > { %1373 = vmatmul.msk.f32.gmra.mxu2 %vm365_vm0, %v1663_v14  ;;  %1389 = vmatmul.msk.f32.gmra.mxu3 %vm365_vm0, %v352_v51 }
  0x85   : > { %1404 = vmatmul.msk.f32.gmra.mxu0 %vm365_vm0, %v351_v45 }
  0x87   : > { %1422 = vmatmul.msk.f32.gmra.mxu1 %vm365_vm0, %v1658_v10 }
  0x8b   : > { %1374 = vmatmul.msk.f32.gmra.mxu2 %vm365_vm0, %v1658_v10  ;;  %1390 = vmatmul.msk.f32.gmra.mxu3 %vm365_vm0, %v1663_v14 }
  0x8c   : > { %v499_v55 = vpop.f32.mrf.mxu1 }
  0x8d   : > { %1405 = vmatmul.msk.f32.gmra.mxu0 %vm365_vm0, %v352_v51 }
  0x8f   : > { %1423 = vmatmul.msk.f32.gmra.mxu1 %vm365_vm0, %v1679_v20 }
  0x92   : > { %v431_v56 = vpop.f32.mrf.mxu0 }
  0x93   : > { %v1814_v57 = vadd.f32 %v499_v55, %v431_v56  ;;  %1375 = vmatmul.msk.f32.gmra.mxu2 %vm365_vm0, %v1679_v20  ;;  %1391 = vmatmul.msk.f32.gmra.mxu3 %vm365_vm0, %v1658_v10 }
  0x94   : > { %v502_v58 = vpop.f32.mrf.mxu1 }
  0x95   : > { %1406 = vmatmul.msk.f32.gmra.mxu0 %vm365_vm0, %v1663_v14 }
  0x96   : > { %v455_v59 = vpop.f32.mrf.mxu2  ;;  %v523_v60 = vpop.f32.mrf.mxu3 }
  0x97   : > { %1424 = vmatmul.msk.f32.gmra.mxu1 %vm365_vm0, %v1695_v26  ;;  %v1824_v61 = vadd.f32 %v523_v60, %v455_v59 }
  0x9a   : > { %v434_v62 = vpop.f32.mrf.mxu0 }
  0x9b   : > { %v1826_v63 = vadd.f32 %v502_v58, %v434_v62  ;;  %1376 = vmatmul.msk.f32.gmra.mxu2 %vm365_vm0, %v1695_v26  ;;  %1392 = vmatmul.msk.f32.gmra.mxu3 %vm365_vm0, %v1679_v20 }
  0x9c   : > { %v505_v0 = vpop.f32.mrf.mxu1 }
  0x9d   : > { %1407 = vmatmul.msk.f32.gmra.mxu0 %vm365_vm0, %v1658_v10 }
  0x9e   : > { %v458_v1 = vpop.f32.mrf.mxu2  ;;  %v526_v2 = vpop.f32.mrf.mxu3 }
  0x9f   : > { %1425 = vmatmul.msk.f32.gmra.mxu1 %vm365_vm0, %v1711_v32  ;;  %v1836_v3 = vadd.f32 %v526_v2, %v458_v1 }
  0xa2   : > { %v437_v4 = vpop.f32.mrf.mxu0 }
  0xa3   : > { %v1838_v5 = vadd.f32 %v505_v0, %v437_v4  ;;  %1377 = vmatmul.msk.f32.gmra.mxu2 %vm365_vm0, %v1711_v32  ;;  %1393 = vmatmul.msk.f32.gmra.mxu3 %vm365_vm0, %v1695_v26 }
  0xa4   : > { %v508_v7 = vpop.f32.mrf.mxu1 }
  0xa5   : > { %1408 = vmatmul.msk.f32.gmra.mxu0 %vm365_vm0, %v1679_v20 }
  0xa6   : > { %v461_v8 = vpop.f32.mrf.mxu2  ;;  %v529_v9 = vpop.f32.mrf.mxu3 }
  0xa7   : > { %1426 = vmatmul.msk.f32.gmra.mxu1 %vm365_vm0, %v1723_v38  ;;  %v1848_v10 = vadd.f32 %v529_v9, %v461_v8 }
  0xaa   : > { %v440_v11 = vpop.f32.mrf.mxu0 }
  0xab   : > { %v1850_v12 = vadd.f32 %v508_v7, %v440_v11  ;;  %1378 = vmatmul.msk.f32.gmra.mxu2 %vm365_vm0, %v1723_v38  ;;  %1394 = vmatmul.msk.f32.gmra.mxu3 %vm365_vm0, %v1711_v32 }
  0xac   : > { %v511_v13 = vpop.f32.mrf.mxu1 }
  0xad   : > { %1409 = vmatmul.msk.f32.gmra.mxu0 %vm365_vm0, %v1695_v26 }
  0xae   : > { %v464_v14 = vpop.f32.mrf.mxu2  ;;  %v532_v15 = vpop.f32.mrf.mxu3 }
  0xaf   : > { %1427 = vmatmul.msk.f32.gmra.mxu1 %vm365_vm0, %v1735_v44  ;;  %v1860_v16 = vadd.f32 %v532_v15, %v464_v14 }
  0xb2   : > { %v443_v17 = vpop.f32.mrf.mxu0 }
  0xb3   : > { %v1862_v18 = vadd.f32 %v511_v13, %v443_v17  ;;  %1379 = vmatmul.msk.f32.gmra.mxu2 %vm365_vm0, %v1735_v44  ;;  %1395 = vmatmul.msk.f32.gmra.mxu3 %vm365_vm0, %v1723_v38 }
  0xb4   : > { %v514_v19 = vpop.f32.mrf.mxu1 }
  0xb5   : > { %1410 = vmatmul.msk.f32.gmra.mxu0 %vm365_vm0, %v1711_v32 }
  0xb6   : > { %v467_v20 = vpop.f32.mrf.mxu2  ;;  %v535_v21 = vpop.f32.mrf.mxu3 }
  0xb7   : > { %1428 = vmatmul.msk.f32.gmra.mxu1 %vm365_vm0, %v1747_v50  ;;  %v1872_v22 = vadd.f32 %v535_v21, %v467_v20 }
  0xba   : > { %v446_v23 = vpop.f32.mrf.mxu0 }
  0xbb   : > { %v1874_v24 = vadd.f32 %v514_v19, %v446_v23  ;;  %1380 = vmatmul.msk.f32.gmra.mxu2 %vm365_vm0, %v1747_v50  ;;  %1396 = vmatmul.msk.f32.gmra.mxu3 %vm365_vm0, %v1735_v44 }
  0xbc   : > { %v517_v25 = vpop.f32.mrf.mxu1 }
  0xbd   : > { %1411 = vmatmul.msk.f32.gmra.mxu0 %vm365_vm0, %v1723_v38 }
  0xbe   : > { %v470_v26 = vpop.f32.mrf.mxu2  ;;  %v538_v27 = vpop.f32.mrf.mxu3 }
  0xbf   : > { %1429 = vmatmul.msk.f32.gmra.mxu1 %vm365_vm0, %v1757_v54  ;;  %v1884_v28 = vadd.f32 %v538_v27, %v470_v26 }
  0xc2   : > { %v449_v29 = vpop.f32.mrf.mxu0 }
  0xc3   : > { %v1886_v30 = vadd.f32 %v517_v25, %v449_v29  ;;  %1381 = vmatmul.msk.f32.gmra.mxu2 %vm365_vm0, %v1757_v54  ;;  %1397 = vmatmul.msk.f32.gmra.mxu3 %vm365_vm0, %v1747_v50  ;;  %v1922_v29 = vld [vmem:[%s2075_s4] ss:$0 sm:$0xff] }
  0xc4   : > { %v520_v31 = vpop.f32.mrf.mxu1 }
  0xc5   : > { %1412 = vmatmul.msk.f32.gmra.mxu0 %vm365_vm0, %v1735_v44 }
  0xc6   : > { %v473_v32 = vpop.f32.mrf.mxu2  ;;  %v541_v33 = vpop.f32.mrf.mxu3 }
  0xc7   : > { %846 = vmatmul.f32.gmra.mxu1 %v1568_v6  ;;  %v1895_v34 = vadd.f32 %v541_v33, %v473_v32 }
  0xca   : > { %v452_v35 = vpop.f32.mrf.mxu0 }
  0xcb   : > { %v1897_v36 = vadd.f32 %v520_v31, %v452_v35  ;;  %610 = vmatmul.f32.gmra.mxu2 %v1568_v6  ;;  %1398 = vmatmul.msk.f32.gmra.mxu3 %vm365_vm0, %v1757_v54  ;;  %v1909_v6 = vld [vmem:[%s2076_s5] ss:$0 sm:$0xff] }
  0xcc   : > { %v802_v37 = vpop.f32.mrf.mxu1 }
  0xcd   : > { %1413 = vmatmul.msk.f32.gmra.mxu0 %vm365_vm0, %v1747_v50 }
  0xce   : > { %v476_v38 = vpop.f32.mrf.mxu2  ;;  %v544_v39 = vpop.f32.mrf.mxu3 }
  0xcf   : > { %v1904_v40 = vadd.f32 %v544_v39, %v476_v38 }
  0xd2   : > { %v735_v41 = vpop.f32.mrf.mxu0 }
  0xd4   : > { %v805_v42 = vpop.f32.mrf.mxu1 }
  0xd6   : > { %v566_v43 = vpop.f32.mrf.mxu2  ;;  %v670_v44 = vpop.f32.mrf.mxu3 }
  0xd7   : > { %v736_v45 = vadd.f32 %v735_v41, %v670_v44  ;;  %v614_v27 = vadd.f32 %v566_v43, %v1814_v57 }
  0xd9   : > { %v850_v47 = vadd.f32 %v802_v37, %v736_v45  ;;  %v634_v57 = vadd.f32 %v1922_v29, %v614_v27 }
  0xda   : > { %v738_v46 = vpop.f32.mrf.mxu0 }
  0xdb   : > { %v870_v49 = vadd.f32 %v1909_v6, %v850_v47 }
  0xdc   : > { %v808_v48 = vpop.f32.mrf.mxu1 }
  0xdd   : > { %v1430_v50 = vmul.f32 -1.442695, %v870_v49 }
  0xde   : > { %v569_v51 = vpop.f32.mrf.mxu2  ;;  %v673_v52 = vpop.f32.mrf.mxu3 }
  0xdf   : > { %1480 = vpow2.f32 %v1430_v50  ;;  %v739_v53 = vadd.f32 %v738_v46, %v673_v52 }
  0xe1   : > { %v851_v55 = vadd.f32 %v805_v42, %v739_v53  ;;  %v615_v53 = vadd.f32 %v569_v51, %v1826_v63 }
  0xe2   : > { %v741_v54 = vpop.f32.mrf.mxu0 }
  0xe3   : > { %v871_v58 = vadd.f32 %v1909_v6, %v851_v55 }
  0xe4   : > { %v811_v56 = vpop.f32.mrf.mxu1 }
  0xe5   : > { %v1481_v59 = vpop.eup %1480  ;;  %v1431_v60 = vmul.f32 -1.442695, %v871_v58 }
  0xe6   : > { %v934_v62 = vadd.f32 1.0, %v1481_v59  ;;  %v1913_v0 = vpop.f32.mrf.mxu2  ;;  %v676_v1 = vpop.f32.mrf.mxu3 }
  0xe7   : > { %1482 = vpow2.f32 %v1431_v60  ;;  %v742_v2 = vadd.f32 %v741_v54, %v676_v1 }
  0xe8   : > { %1484 = vrcp.f32 %v934_v62  ;;  %v961_v31 = vand.u32 2147483648, %v934_v62  ;;  %v959_v35 = vand.u32 2147483647, %v934_v62  ;;  %vm955_vm2 = vweird.f32 %v934_v62 }
  0xe9   : > { %v852_v7 = vadd.f32 %v808_v48, %v742_v2 }
  0xea   : > { %v744_v4 = vpop.f32.mrf.mxu0  ;;  %v962_v43 = vor.u32 1.1754944e-38, %v961_v31  ;;  %vm960_vm4 = vcmp.eq.f32.partialorder %v959_v35, 8.507059e+37 }
  0xeb   : > { %v872_v9 = vadd.f32 %v1909_v6, %v852_v7  ;;  %v635_v7 = vadd.f32 %v1922_v29, %v615_v53 }
  0xec   : > { %v814_v8 = vpop.f32.mrf.mxu1 }
  0xed   : > { %v1483_v11 = vpop.eup %1482  ;;  %v1432_v13 = vmul.f32 -1.442695, %v872_v9 }
  0xee   : > { %v1485_v14 = vpop.eup %1484  ;;  %v935_v15 = vadd.f32 1.0, %v1483_v11  ;;  %v679_v17 = vpop.f32.mrf.mxu3 }
  0xef   : > { %v951_v19 = vmul.f32 %v1485_v14, %v934_v62  ;;  %1486 = vpow2.f32 %v1432_v13  ;;  %v745_v20 = vadd.f32 %v744_v4, %v679_v17  ;;  %v1916_v21 = vpop.f32.mrf.mxu2  ;;  %vm956_vm1 = vweird.f32 %v1485_v14 }
  0xf0   : > { %1488 = vrcp.f32 %v935_v15  ;;  %vm957_vm3 = vmor %vm955_vm2, %vm956_vm1  ;;  %v976_v54 = vand.u32 2147483648, %v935_v15  ;;  %v974_v60 = vand.u32 2147483647, %v935_v15  ;;  %vm970_vm6 = vweird.f32 %v935_v15 }
  0xf1   : > { %v952_v25 = vsub.f32 1.0, %v951_v19  ;;  %v853_v26 = vadd.f32 %v811_v56, %v745_v20 }
  0xf2   : > { %v747_v23 = vpop.f32.mrf.mxu0  ;;  %v977_v9 = vor.u32 1.1754944e-38, %v976_v54  ;;  %vm975_vm8 = vcmp.eq.f32.partialorder %v974_v60, 8.507059e+37 }
  0xf3   : > { %v953_v33 = vmul.f32 %v1485_v14, %v952_v25  ;;  %v873_v37 = vadd.f32 %v1909_v6, %v853_v26  ;;  %v616_v25 = vadd.f32 %v1913_v0, %v1838_v5 }
  0xf4   : > { %v817_v32 = vpop.f32.mrf.mxu1 }
  0xf5   : > { %v1487_v38 = vpop.eup %1486  ;;  %v954_v39 = vadd.f32 %v1485_v14, %v953_v33  ;;  %v1433_v41 = vmul.f32 -1.442695, %v873_v37  ;;  %v636_v5 = vadd.f32 %v1922_v29, %v616_v25 }
  0xf6   : > { %v1489_v42 = vpop.eup %1488  ;;  %v1926_v44 = vadd.f32 1.0, %v1487_v38  ;;  %v682_v45 = vpop.f32.mrf.mxu3 }
  0xf7   : > { %v958_v46 = vsel %vm957_vm3, %v1485_v14, %v954_v39  ;;  %v966_v47 = vmul.f32 %v1489_v42, %v935_v15  ;;  %1490 = vpow2.f32 %v1433_v41  ;;  %v1936_v55 = vpop.f32.mrf.mxu2  ;;  %v748_v56 = vadd.f32 %v747_v23, %v682_v45 }
  0xf8   : > { %v963_v48 = vsel %vm960_vm4, %v962_v43, %v958_v46  ;;  %1492 = vrcp.f32 %v1926_v44  ;;  %vm971_vm5 = vweird.f32 %v1489_v42  ;;  %v991_v26 = vand.u32 2147483648, %v1926_v44 }
  0xf9   : > { %v1190_v50 = vmul.f32 %v963_v48, %v634_v57  ;;  %v967_v52 = vsub.f32 1.0, %v966_v47  ;;  %v854_v62 = vadd.f32 %v814_v8, %v748_v56  ;;  %vm972_vm7 = vmor %vm970_vm6, %vm971_vm5  ;;  %v989_v35 = vand.u32 2147483647, %v1926_v44 }
  0xfa   : > { %v750_v49 = vpop.f32.mrf.mxu0  ;;  %vm985_vm10 = vweird.f32 %v1926_v44  ;;  %v992_v0 = vor.u32 1.1754944e-38, %v991_v26  ;;  %v618_v25 = vadd.f32 %v1936_v55, %v1862_v18 }
  0xfb   : > { %1206 = vst.msk [vmem:[%s1932_s29] sm:$0xff] %vm365_vm0, %v1190_v50  ;;  %v968_v59 = vmul.f32 %v1489_v42, %v967_v52  ;;  %v874_v51 = vadd.f32 %v1909_v6, %v854_v62  ;;  %vm990_vm12 = vcmp.eq.f32.partialorder %v989_v35, 8.507059e+37 }
  0xfc   : > { %v820_v58 = vpop.f32.mrf.mxu1 }
  0xfd   : > { %v1491_v1 = vpop.eup %1490  ;;  %v969_v2 = vadd.f32 %v1489_v42, %v968_v59  ;;  %v1434_v23 = vmul.f32 -1.442695, %v874_v51 }
  0xfe   : > { %v1493_v4 = vpop.eup %1492  ;;  %v937_v63 = vadd.f32 1.0, %v1491_v1  ;;  %v685_v11 = vpop.f32.mrf.mxu3 }
  0xff   : > { %v973_v13 = vsel %vm972_vm7, %v1489_v42, %v969_v2  ;;  %v981_v14 = vmul.f32 %v1493_v4, %v1926_v44  ;;  %v751_v17 = vadd.f32 %v750_v49, %v685_v11  ;;  %vm986_vm9 = vweird.f32 %v1493_v4  ;;  %v1949_v37 = vpop.f32.mrf.mxu2 }
 0x100   : > { %v978_v19 = vsel %vm975_vm8, %v977_v9, %v973_v13  ;;  %1494 = vrcp.f32 %v937_v63  ;;  %vm987_vm11 = vmor %vm985_vm10, %vm986_vm9  ;;  %v617_v44 = vadd.f32 %v1916_v21, %v1850_v12  ;;  %v1004_v53 = vand.u32 2147483647, %v937_v63 }
 0x101   : > { %v1191_v20 = vmul.f32 %v978_v19, %v635_v7  ;;  %v982_v15 = vsub.f32 1.0, %v981_v14  ;;  %v855_v27 = vadd.f32 %v817_v32, %v751_v17  ;;  %1496 = vpow2.f32 %v1434_v23 }
 0x102   : > { %v753_v8 = vpop.f32.mrf.mxu0  ;;  %v1006_v54 = vand.u32 2147483648, %v937_v63  ;;  %vm1000_vm14 = vweird.f32 %v937_v63  ;;  %vm1005_vm1 = vcmp.eq.f32.partialorder %v1004_v53, 8.507059e+37 }
 0x103   : > { %1207 = vst.msk [vmem:[%s1932_s29 + $0x8] sm:$0xff] %vm365_vm0, %v1191_v20  ;;  %v983_v33 = vmul.f32 %v1493_v4, %v982_v15  ;;  %v875_v38 = vadd.f32 %v1909_v6, %v855_v27 }
 0x104   : > { %v823_v31 = vpop.f32.mrf.mxu1  ;;  %v1007_v12 = vor.u32 1.1754944e-38, %v1006_v54 }
 0x105   : > { %v984_v39 = vadd.f32 %v1493_v4, %v983_v33  ;;  %v1435_v32 = vmul.f32 -1.442695, %v875_v38 }
 0x106   : > { %v1495_v41 = vpop.eup %1494  ;;  %v688_v42 = vpop.f32.mrf.mxu3 }
 0x107   : > { %v988_v57 = vsel %vm987_vm11, %v1493_v4, %v984_v39  ;;  %v996_v43 = vmul.f32 %v1495_v41, %v937_v63  ;;  %v754_v45 = vadd.f32 %v753_v8, %v688_v42  ;;  %1498 = vpow2.f32 %v1435_v32  ;;  %v1497_v48 = vpop.eup %1496  ;;  %v1960_v21 = vpop.f32.mrf.mxu2 }
 0x108   : > { %v993_v46 = vsel %vm990_vm12, %v992_v0, %v988_v57  ;;  %v938_v56 = vadd.f32 1.0, %v1497_v48  ;;  %vm1001_vm13 = vweird.f32 %v1495_v41  ;;  %v638_v57 = vadd.f32 %v1922_v29, %v618_v25 }
 0x109   : > { %v1192_v49 = vmul.f32 %v993_v46, %v636_v5  ;;  %v997_v50 = vsub.f32 1.0, %v996_v43  ;;  %v856_v52 = vadd.f32 %v820_v58, %v754_v45  ;;  %v637_v58 = vadd.f32 %v1922_v29, %v617_v44  ;;  %vm1002_vm15 = vmor %vm1000_vm14, %vm1001_vm13 }
 0x10a   : > { %v756_v47 = vpop.f32.mrf.mxu0  ;;  %1500 = vrcp.f32 %v938_v56  ;;  %v1021_v27 = vand.u32 2147483648, %v938_v56  ;;  %vm1015_vm3 = vweird.f32 %v938_v56  ;;  %v619_v43 = vadd.f32 %v1949_v37, %v1874_v24 }
 0x10b   : > { %1208 = vst.msk [vmem:[%s1932_s29 + $0x10] sm:$0xff] %vm365_vm0, %v1192_v49  ;;  %v998_v60 = vmul.f32 %v1495_v41, %v997_v50  ;;  %v876_v62 = vadd.f32 %v1909_v6, %v856_v52 }
 0x10c   : > { %v826_v59 = vpop.f32.mrf.mxu1  ;;  %v1022_v55 = vor.u32 1.1754944e-38, %v1021_v27  ;;  %v639_v37 = vadd.f32 %v1922_v29, %v619_v43 }
 0x10d   : > { %v999_v1 = vadd.f32 %v1495_v41, %v998_v60  ;;  %v1436_v2 = vmul.f32 -1.442695, %v876_v62  ;;  %v1499_v4 = vpop.eup %1498 }
 0x10e   : > { %v691_v7 = vpop.f32.mrf.mxu3  ;;  %v939_v51 = vadd.f32 1.0, %v1499_v4 }
 0x10f   : > { %v1003_v9 = vsel %vm1002_vm15, %v1495_v41, %v999_v1  ;;  %1502 = vpow2.f32 %v1436_v2  ;;  %v757_v11 = vadd.f32 %v756_v47, %v691_v7  ;;  %v1970_v32 = vpop.f32.mrf.mxu2 }
 0x110   : > { %v1008_v13 = vsel %vm1005_vm1, %v1007_v12, %v1003_v9  ;;  %1504 = vrcp.f32 %v939_v51  ;;  %v1501_v63 = vpop.eup %1500  ;;  %v1034_v48 = vand.u32 2147483647, %v939_v51  ;;  %v1036_v49 = vand.u32 2147483648, %v939_v51 }
 0x111   : > { %v1193_v17 = vmul.f32 %v1008_v13, %v637_v58  ;;  %v857_v19 = vadd.f32 %v823_v31, %v757_v11  ;;  %v1011_v20 = vmul.f32 %v1501_v63, %v938_v56  ;;  %vm1016_vm2 = vweird.f32 %v1501_v63 }
 0x112   : > { %v759_v14 = vpop.f32.mrf.mxu0  ;;  %v1019_v31 = vand.u32 2147483647, %v938_v56  ;;  %vm1017_vm4 = vmor %vm1015_vm3, %vm1016_vm2  ;;  %vm1030_vm7 = vweird.f32 %v939_v51  ;;  %vm1035_vm9 = vcmp.eq.f32.partialorder %v1034_v48, 8.507059e+37 }
 0x113   : > { %1209 = vst.msk [vmem:[%s1932_s29 + $0x18] sm:$0xff] %vm365_vm0, %v1193_v17  ;;  %v877_v15 = vadd.f32 %v1909_v6, %v857_v19  ;;  %v1012_v26 = vsub.f32 1.0, %v1011_v20 }
 0x114   : > { %v829_v8 = vpop.f32.mrf.mxu1  ;;  %vm1020_vm5 = vcmp.eq.f32.partialorder %v1019_v31, 8.507059e+37 }
 0x115   : > { %v1503_v23 = vpop.eup %1502  ;;  %v1437_v35 = vmul.f32 -1.442695, %v877_v15  ;;  %v1013_v41 = vmul.f32 %v1501_v63, %v1012_v26 }
 0x116   : > { %v1967_v33 = vadd.f32 1.0, %v1503_v23  ;;  %v694_v38 = vpop.f32.mrf.mxu3  ;;  %v1505_v39 = vpop.eup %1504 }
 0x117   : > { %v760_v5 = vadd.f32 %v759_v14, %v694_v38  ;;  %v1026_v0 = vmul.f32 %v1505_v39, %v939_v51  ;;  %v1014_v18 = vadd.f32 %v1501_v63, %v1013_v41  ;;  %vm1031_vm6 = vweird.f32 %v1505_v39  ;;  %v590_v19 = vpop.f32.mrf.mxu2 }
 0x118   : > { %1506 = vrcp.f32 %v1967_v33  ;;  %vm1032_vm8 = vmor %vm1030_vm7, %vm1031_vm6  ;;  %v620_v51 = vadd.f32 %v1960_v21, %v1886_v30  ;;  %v1049_v17 = vand.u32 2147483647, %v1967_v33  ;;  %vm1045_vm11 = vweird.f32 %v1967_v33 }
 0x119   : > { %1508 = vpow2.f32 %v1437_v35  ;;  %v1027_v45 = vsub.f32 1.0, %v1026_v0  ;;  %v858_v46 = vadd.f32 %v826_v59, %v760_v5  ;;  %v1018_v47 = vsel %vm1017_vm4, %v1501_v63, %v1014_v18 }
 0x11a   : > { %v762_v42 = vpop.f32.mrf.mxu0  ;;  %v1023_v50 = vsel %vm1020_vm5, %v1022_v55, %v1018_v47  ;;  %v1037_v59 = vor.u32 1.1754944e-38, %v1036_v49  ;;  %v1051_v63 = vand.u32 2147483648, %v1967_v33  ;;  %vm1050_vm13 = vcmp.eq.f32.partialorder %v1049_v17, 8.507059e+37 }
 0x11b   : > { %v1028_v52 = vmul.f32 %v1505_v39, %v1027_v45  ;;  %v878_v44 = vadd.f32 %v1909_v6, %v858_v46  ;;  %v1194_v54 = vmul.f32 %v1023_v50, %v638_v57  ;;  %v621_v46 = vadd.f32 %v1970_v32, %v1897_v36 }
 0x11c   : > { %v832_v53 = vpop.f32.mrf.mxu1  ;;  %v1052_v25 = vor.u32 1.1754944e-38, %v1051_v63 }
 0x11d   : > { %v1029_v60 = vadd.f32 %v1505_v39, %v1028_v52  ;;  %v1438_v62 = vmul.f32 -1.442695, %v878_v44  ;;  %1210 = vst.msk [vmem:[%s1932_s29 + $0x20] sm:$0xff] %vm365_vm0, %v1194_v54  ;;  %v641_v32 = vadd.f32 %v1922_v29, %v621_v46 }
 0x11e   : > { %v1507_v56 = vpop.eup %1506  ;;  %v697_v1 = vpop.f32.mrf.mxu3 }
 0x11f   : > { %v1509_v24 = vpop.eup %1508  ;;  %v1041_v2 = vmul.f32 %v1507_v56, %v1967_v33  ;;  %v763_v4 = vadd.f32 %v762_v42, %v697_v1  ;;  %v1033_v58 = vsel %vm1032_vm8, %v1505_v39, %v1029_v60  ;;  %1510 = vpow2.f32 %v1438_v62  ;;  %v593_v55 = vpop.f32.mrf.mxu2 }
 0x120   : > { %v1980_v12 = vadd.f32 1.0, %v1509_v24  ;;  %v1038_v9 = vsel %vm1035_vm9, %v1037_v59, %v1033_v58  ;;  %vm1046_vm10 = vweird.f32 %v1507_v56 }
 0x121   : > { %v1042_v11 = vsub.f32 1.0, %v1041_v2  ;;  %v859_v13 = vadd.f32 %v829_v8, %v763_v4  ;;  %v1195_v14 = vmul.f32 %v1038_v9, %v639_v37  ;;  %v640_v8 = vadd.f32 %v1922_v29, %v620_v51  ;;  %vm1047_vm12 = vmor %vm1045_vm11, %vm1046_vm10 }
 0x122   : > { %v765_v7 = vpop.f32.mrf.mxu0  ;;  %1512 = vrcp.f32 %v1980_v12  ;;  %v1066_v18 = vand.u32 2147483648, %v1980_v12  ;;  %v1064_v48 = vand.u32 2147483647, %v1980_v12  ;;  %vm1060_vm15 = vweird.f32 %v1980_v12 }
 0x123   : > { %v1043_v20 = vmul.f32 %v1507_v56, %v1042_v11  ;;  %v879_v15 = vadd.f32 %v1909_v6, %v859_v13  ;;  %1211 = vst.msk [vmem:[%s1932_s29 + $0x28] sm:$0xff] %vm365_vm0, %v1195_v14  ;;  %v622_v4 = vadd.f32 %v590_v19, %v1824_v61 }
 0x124   : > { %v835_v27 = vpop.f32.mrf.mxu1  ;;  %vm1065_vm2 = vcmp.eq.f32.partialorder %v1064_v48, 8.507059e+37 }
 0x125   : > { %v1044_v23 = vadd.f32 %v1507_v56, %v1043_v20  ;;  %v1439_v30 = vmul.f32 -1.442695, %v879_v15  ;;  %v1511_v21 = vpop.eup %1510  ;;  %v642_v20 = vadd.f32 %v1922_v29, %v622_v4 }
 0x126   : > { %v700_v26 = vpop.f32.mrf.mxu3  ;;  %v942_v38 = vadd.f32 1.0, %v1511_v21 }
 0x127   : > { %v1048_v35 = vsel %vm1047_vm12, %v1507_v56, %v1044_v23  ;;  %1514 = vpow2.f32 %v1439_v30  ;;  %v766_v39 = vadd.f32 %v765_v7, %v700_v26  ;;  %v1067_v56 = vor.u32 1.1754944e-38, %v1066_v18  ;;  %v596_v13 = vpop.f32.mrf.mxu2 }
 0x128   : > { %v1513_v41 = vpop.eup %1512  ;;  %v1053_v31 = vsel %vm1050_vm13, %v1052_v25, %v1048_v35  ;;  %1516 = vrcp.f32 %v942_v38  ;;  %v1081_v58 = vand.u32 2147483648, %v942_v38  ;;  %v1079_v7 = vand.u32 2147483647, %v942_v38 }
 0x129   : > { %v1196_v0 = vmul.f32 %v1053_v31, %v640_v8  ;;  %v1056_v33 = vmul.f32 %v1513_v41, %v1980_v12  ;;  %v860_v42 = vadd.f32 %v832_v53, %v766_v39  ;;  %vm1061_vm14 = vweird.f32 %v1513_v41 }
 0x12a   : > { %v768_v5 = vpop.f32.mrf.mxu0  ;;  %vm1062_vm1 = vmor %vm1060_vm15, %vm1061_vm14  ;;  %vm1075_vm4 = vweird.f32 %v942_v38  ;;  %v1082_v15 = vor.u32 1.1754944e-38, %v1081_v58  ;;  %vm1080_vm6 = vcmp.eq.f32.partialorder %v1079_v7, 8.507059e+37  ;;  %v623_v25 = vadd.f32 %v593_v55, %v1836_v3 }
 0x12b   : > { %1212 = vst.msk [vmem:[%s1932_s29 + $0x30] sm:$0xff] %vm365_vm0, %v1196_v0  ;;  %v1057_v57 = vsub.f32 1.0, %v1056_v33  ;;  %v880_v43 = vadd.f32 %v1909_v6, %v860_v42 }
 0x12c   : > { %v838_v36 = vpop.f32.mrf.mxu1  ;;  %v643_v42 = vadd.f32 %v1922_v29, %v623_v25 }
 0x12d   : > { %v1515_v45 = vpop.eup %1514  ;;  %v1058_v47 = vmul.f32 %v1513_v41, %v1057_v57  ;;  %v1440_v50 = vmul.f32 -1.442695, %v880_v43 }
 0x12e   : > { %v2000_v49 = vadd.f32 1.0, %v1515_v45  ;;  %v703_v52 = vpop.f32.mrf.mxu3  ;;  %v1517_v44 = vpop.eup %1516 }
 0x12f   : > { %v1059_v53 = vadd.f32 %v1513_v41, %v1058_v47  ;;  %v769_v54 = vadd.f32 %v768_v5, %v703_v52  ;;  %v1071_v60 = vmul.f32 %v1517_v44, %v942_v38  ;;  %vm1076_vm3 = vweird.f32 %v1517_v44  ;;  %v599_v48 = vpop.f32.mrf.mxu2 }
 0x130   : > { %1518 = vrcp.f32 %v2000_v49  ;;  %vm1077_vm5 = vmor %vm1075_vm4, %vm1076_vm3  ;;  %v1094_v38 = vand.u32 2147483647, %v2000_v49  ;;  %v1096_v39 = vand.u32 2147483648, %v2000_v49  ;;  %vm1090_vm8 = vweird.f32 %v2000_v49 }
 0x131   : > { %v1063_v1 = vsel %vm1062_vm1, %v1513_v41, %v1059_v53  ;;  %1520 = vpow2.f32 %v1440_v50  ;;  %v1072_v37 = vsub.f32 1.0, %v1071_v60  ;;  %v861_v59 = vadd.f32 %v835_v27, %v769_v54 }
 0x132   : > { %v771_v62 = vpop.f32.mrf.mxu0  ;;  %v1068_v24 = vsel %vm1065_vm2, %v1067_v56, %v1063_v1  ;;  %vm1095_vm10 = vcmp.eq.f32.partialorder %v1094_v38, 8.507059e+37  ;;  %v1097_v57 = vor.u32 1.1754944e-38, %v1096_v39 }
 0x133   : > { %v1197_v2 = vmul.f32 %v1068_v24, %v641_v32  ;;  %v1073_v12 = vmul.f32 %v1517_v44, %v1072_v37  ;;  %v881_v9 = vadd.f32 %v1909_v6, %v861_v59 }
 0x134   : > { %v841_v41 = vpop.f32.mrf.mxu1 }
 0x135   : > { %1213 = vst.msk [vmem:[%s1932_s29 + $0x38] sm:$0xff] %vm365_vm0, %v1197_v2  ;;  %v1074_v11 = vadd.f32 %v1517_v44, %v1073_v12  ;;  %v1441_v14 = vmul.f32 -1.442695, %v881_v9 }
 0x136   : > { %v1519_v51 = vpop.eup %1518  ;;  %v706_v17 = vpop.f32.mrf.mxu3 }
 0x137   : > { %v1521_v63 = vpop.eup %1520  ;;  %v1086_v61 = vmul.f32 %v1519_v51, %v2000_v49  ;;  %v772_v19 = vadd.f32 %v771_v62, %v706_v17  ;;  %v1078_v23 = vsel %vm1077_vm5, %v1517_v44, %v1074_v11  ;;  %1522 = vpow2.f32 %v1441_v14 }
 0x138   : > { %v944_v30 = vadd.f32 1.0, %v1521_v63  ;;  %v1083_v8 = vsel %vm1080_vm6, %v1082_v15, %v1078_v23  ;;  %vm1091_vm7 = vweird.f32 %v1519_v51  ;;  %v625_v63 = vadd.f32 %v599_v48, %v1860_v16 }
 0x139   : > { %v1087_v26 = vsub.f32 1.0, %v1086_v61  ;;  %v862_v27 = vadd.f32 %v838_v36, %v772_v19  ;;  %v1198_v35 = vmul.f32 %v1083_v8, %v642_v20  ;;  %vm1092_vm9 = vmor %vm1090_vm8, %vm1091_vm7  ;;  %v624_v36 = vadd.f32 %v596_v13, %v1848_v10  ;;  %v602_v13 = vpop.f32.mrf.mxu2 }
 0x13a   : > { %v774_v21 = vpop.f32.mrf.mxu0  ;;  %1524 = vrcp.f32 %v944_v30  ;;  %v1111_v54 = vand.u32 2147483648, %v944_v30  ;;  %v1109_v1 = vand.u32 2147483647, %v944_v30  ;;  %vm1105_vm12 = vweird.f32 %v944_v30 }
 0x13b   : > { %v1088_v31 = vmul.f32 %v1519_v51, %v1087_v26  ;;  %v882_v5 = vadd.f32 %v1909_v6, %v862_v27  ;;  %1214 = vst.msk [vmem:[%s1932_s29 + $0x40] sm:$0xff] %vm365_vm0, %v1198_v35  ;;  %v644_v9 = vadd.f32 %v1922_v29, %v624_v36  ;;  %v645_v16 = vadd.f32 %v1922_v29, %v625_v63 }
 0x13c   : > { %v844_v60 = vpop.f32.mrf.mxu1  ;;  %v1112_v12 = vor.u32 1.1754944e-38, %v1111_v54  ;;  %vm1110_vm14 = vcmp.eq.f32.partialorder %v1109_v1, 8.507059e+37 }
 0x13d   : > { %v1089_v0 = vadd.f32 %v1519_v51, %v1088_v31  ;;  %v1442_v33 = vmul.f32 -1.442695, %v882_v5  ;;  %v1523_v3 = vpop.eup %1522 }
 0x13e   : > { %v709_v18 = vpop.f32.mrf.mxu3  ;;  %v2019_v43 = vadd.f32 1.0, %v1523_v3 }
 0x13f   : > { %v1093_v55 = vsel %vm1092_vm9, %v1519_v51, %v1089_v0  ;;  %1526 = vpow2.f32 %v1442_v33  ;;  %v775_v45 = vadd.f32 %v774_v21, %v709_v18 }
 0x140   : > { %v1525_v46 = vpop.eup %1524  ;;  %v1098_v47 = vsel %vm1095_vm10, %v1097_v57, %v1093_v55  ;;  %1528 = vrcp.f32 %v2019_v43  ;;  %v1126_v20 = vand.u32 2147483648, %v2019_v43  ;;  %v1124_v61 = vand.u32 2147483647, %v2019_v43 }
 0x141   : > { %v1199_v50 = vmul.f32 %v1098_v47, %v643_v42  ;;  %v1101_v52 = vmul.f32 %v1525_v46, %v944_v30  ;;  %v863_v49 = vadd.f32 %v841_v41, %v775_v45  ;;  %vm1106_vm11 = vweird.f32 %v1525_v46  ;;  %v605_v45 = vpop.f32.mrf.mxu2 }
 0x142   : > { %v777_v44 = vpop.f32.mrf.mxu0  ;;  %vm1107_vm13 = vmor %vm1105_vm12, %vm1106_vm11  ;;  %vm1120_vm1 = vweird.f32 %v2019_v43  ;;  %v1127_v35 = vor.u32 1.1754944e-38, %v1126_v20  ;;  %vm1125_vm3 = vcmp.eq.f32.partialorder %v1124_v61, 8.507059e+37  ;;  %v626_v42 = vadd.f32 %v602_v13, %v1872_v22 }
 0x143   : > { %1215 = vst.msk [vmem:[%s1932_s29 + $0x48] sm:$0xff] %vm365_vm0, %v1199_v50  ;;  %v1102_v53 = vsub.f32 1.0, %v1101_v52  ;;  %v883_v56 = vadd.f32 %v1909_v6, %v863_v49  ;;  %v627_v36 = vadd.f32 %v605_v45, %v1884_v28 }
 0x144   : > { %v847_v26 = vpop.f32.mrf.mxu1  ;;  %v646_v22 = vadd.f32 %v1922_v29, %v626_v42 }
 0x145   : > { %v1527_v62 = vpop.eup %1526  ;;  %v1103_v32 = vmul.f32 %v1525_v46, %v1102_v53  ;;  %v1443_v37 = vmul.f32 -1.442695, %v883_v56 }
 0x146   : > { %v2026_v24 = vadd.f32 1.0, %v1527_v62  ;;  %v712_v59 = vpop.f32.mrf.mxu3  ;;  %v1529_v2 = vpop.eup %1528 }
 0x147   : > { %v1104_v4 = vadd.f32 %v1525_v46, %v1103_v32  ;;  %v778_v58 = vadd.f32 %v777_v44, %v712_v59  ;;  %v1116_v7 = vmul.f32 %v1529_v2, %v2019_v43  ;;  %vm1121_vm15 = vweird.f32 %v1529_v2 }
 0x148   : > { %1530 = vrcp.f32 %v2026_v24  ;;  %vm1122_vm2 = vmor %vm1120_vm1, %vm1121_vm15  ;;  %v1141_v57 = vand.u32 2147483648, %v2026_v24  ;;  %v1139_v55 = vand.u32 2147483647, %v2026_v24  ;;  %vm1135_vm5 = vweird.f32 %v2026_v24 }
 0x149   : > { %v1108_v10 = vsel %vm1107_vm13, %v1525_v46, %v1104_v4  ;;  %1532 = vpow2.f32 %v1443_v37  ;;  %v1117_v11 = vsub.f32 1.0, %v1116_v7  ;;  %v864_v14 = vadd.f32 %v844_v60, %v778_v58 }
 0x14a   : > { %v1113_v51 = vsel %vm1110_vm14, %v1112_v12, %v1108_v10  ;;  %v780_v23 = vpop.f32.mrf.mxu0  ;;  %v1142_v50 = vor.u32 1.1754944e-38, %v1141_v57  ;;  %vm1140_vm7 = vcmp.eq.f32.partialorder %v1139_v55, 8.507059e+37  ;;  %v647_v12 = vadd.f32 %v1922_v29, %v627_v36 }
 0x14b   : > { %v1200_v17 = vmul.f32 %v1113_v51, %v644_v9  ;;  %v1118_v15 = vmul.f32 %v1529_v2, %v1117_v11  ;;  %v884_v19 = vadd.f32 %v1909_v6, %v864_v14 }
 0x14d   : > { %1216 = vst.msk [vmem:[%s1932_s29 + $0x50] sm:$0xff] %vm365_vm0, %v1200_v17  ;;  %v1119_v21 = vadd.f32 %v1529_v2, %v1118_v15  ;;  %v1444_v8 = vmul.f32 -1.442695, %v884_v19 }
 0x14e   : > { %v1531_v30 = vpop.eup %1530  ;;  %v715_v25 = vpop.f32.mrf.mxu3 }
 0x14f   : > { %v1533_v27 = vpop.eup %1532  ;;  %v1131_v38 = vmul.f32 %v1531_v30, %v2026_v24  ;;  %v781_v39 = vadd.f32 %v780_v23, %v715_v25  ;;  %v1123_v41 = vsel %vm1122_vm2, %v1529_v2, %v1119_v21  ;;  %1534 = vpow2.f32 %v1444_v8  ;;  %v608_v24 = vpop.f32.mrf.mxu2 }
 0x150   : > { %v947_v31 = vadd.f32 1.0, %v1533_v27  ;;  %v1128_v5 = vsel %vm1125_vm3, %v1127_v35, %v1123_v41  ;;  %vm1136_vm4 = vweird.f32 %v1531_v30  ;;  %v628_v11 = vadd.f32 %v608_v24, %v1895_v34 }
 0x151   : > { %v1132_v0 = vsub.f32 1.0, %v1131_v38  ;;  %v865_v33 = vadd.f32 %v847_v26, %v781_v39  ;;  %v1201_v3 = vmul.f32 %v1128_v5, %v645_v16  ;;  %vm1137_vm6 = vmor %vm1135_vm5, %vm1136_vm4 }
 0x152   : > { %1536 = vrcp.f32 %v947_v31  ;;  %v1156_v60 = vand.u32 2147483648, %v947_v31  ;;  %v1154_v1 = vand.u32 2147483647, %v947_v31  ;;  %vm1150_vm9 = vweird.f32 %v947_v31 }
 0x153   : > { %v1133_v18 = vmul.f32 %v1531_v30, %v1132_v0  ;;  %v885_v43 = vadd.f32 %v1909_v6, %v865_v33  ;;  %1217 = vst.msk [vmem:[%s1932_s29 + $0x58] sm:$0xff] %vm365_vm0, %v1201_v3  ;;  %v648_v61 = vadd.f32 %v1922_v29, %v628_v11 }
 0x154   : > { %v1157_v4 = vor.u32 1.1754944e-38, %v1156_v60  ;;  %vm1155_vm11 = vcmp.eq.f32.partialorder %v1154_v1, 8.507059e+37 }
 0x155   : > { %v1134_v46 = vadd.f32 %v1531_v30, %v1133_v18  ;;  %v1445_v47 = vmul.f32 -1.442695, %v885_v43  ;;  %v1535_v48 = vpop.eup %1534 }
 0x156   : > { %v948_v49 = vadd.f32 1.0, %v1535_v48 }
 0x157   : > { %v1138_v52 = vsel %vm1137_vm6, %v1531_v30, %v1134_v46  ;;  %1538 = vpow2.f32 %v1445_v47  ;;  %v611_v23 = vpop.f32.mrf.mxu2 }
 0x158   : > { %v1537_v44 = vpop.eup %1536  ;;  %v1143_v53 = vsel %vm1140_vm7, %v1142_v50, %v1138_v52  ;;  %1540 = vrcp.f32 %v948_v49  ;;  %v1171_v51 = vand.u32 2147483648, %v948_v49  ;;  %v1169_v14 = vand.u32 2147483647, %v948_v49 }
 0x159   : > { %v1202_v6 = vmul.f32 %v1143_v53, %v646_v22  ;;  %v1146_v54 = vmul.f32 %v1537_v44, %v947_v31  ;;  %vm1151_vm8 = vweird.f32 %v1537_v44  ;;  %vm1165_vm13 = vweird.f32 %v948_v49 }
 0x15a   : > { %vm1152_vm10 = vmor %vm1150_vm9, %vm1151_vm8  ;;  %v1172_v20 = vor.u32 1.1754944e-38, %v1171_v51  ;;  %vm1170_vm15 = vcmp.eq.f32.partialorder %v1169_v14, 8.507059e+37  ;;  %v629_v25 = vadd.f32 %v611_v23, %v1904_v40 }
 0x15b   : > { %1218 = vst.msk [vmem:[%s1932_s29 + $0x60] sm:$0xff] %vm365_vm0, %v1202_v6  ;;  %v1147_v56 = vsub.f32 1.0, %v1146_v54 }
 0x15c   : > { %v649_v38 = vadd.f32 %v1922_v29, %v629_v25 }
 0x15d   : > { %v1539_v62 = vpop.eup %1538  ;;  %v1148_v32 = vmul.f32 %v1537_v44, %v1147_v56 }
 0x15e   : > { %v949_v37 = vadd.f32 1.0, %v1539_v62  ;;  %v1541_v59 = vpop.eup %1540 }
 0x15f   : > { %v1149_v2 = vadd.f32 %v1537_v44, %v1148_v32  ;;  %v1161_v58 = vmul.f32 %v1541_v59, %v948_v49  ;;  %vm1166_vm12 = vweird.f32 %v1541_v59 }
 0x160   : > { %1542 = vrcp.f32 %v949_v37  ;;  %vm1167_vm14 = vmor %vm1165_vm13, %vm1166_vm12  ;;  %v1186_v8 = vand.u32 2147483648, %v949_v37  ;;  %v1184_v27 = vand.u32 2147483647, %v949_v37  ;;  %vm1180_vm2 = vweird.f32 %v949_v37 }
 0x161   : > { %v1153_v7 = vsel %vm1152_vm10, %v1537_v44, %v1149_v2  ;;  %v1162_v10 = vsub.f32 1.0, %v1161_v58 }
 0x162   : > { %v1158_v9 = vsel %vm1155_vm11, %v1157_v4, %v1153_v7  ;;  %v1187_v35 = vor.u32 1.1754944e-38, %v1186_v8  ;;  %vm1185_vm4 = vcmp.eq.f32.partialorder %v1184_v27, 8.507059e+37 }
 0x163   : > { %v1203_v28 = vmul.f32 %v1158_v9, %v647_v12  ;;  %v1163_v13 = vmul.f32 %v1541_v59, %v1162_v10 }
 0x165   : > { %1219 = vst.msk [vmem:[%s1932_s29 + $0x68] sm:$0xff] %vm365_vm0, %v1203_v28  ;;  %v1164_v63 = vadd.f32 %v1541_v59, %v1163_v13 }
 0x166   : > { %v1543_v17 = vpop.eup %1542 }
 0x167   : > { %v1176_v15 = vmul.f32 %v1543_v17, %v949_v37  ;;  %v1168_v19 = vsel %vm1167_vm14, %v1541_v59, %v1164_v63  ;;  %vm1181_vm1 = vweird.f32 %v1543_v17 }
 0x168   : > { %v1173_v30 = vsel %vm1170_vm15, %v1172_v20, %v1168_v19  ;;  %vm1182_vm3 = vmor %vm1180_vm2, %vm1181_vm1 }
 0x169   : > { %v1177_v21 = vsub.f32 1.0, %v1176_v15  ;;  %v1204_v34 = vmul.f32 %v1173_v30, %v648_v61 }
 0x16b   : > { %v1178_v26 = vmul.f32 %v1543_v17, %v1177_v21  ;;  %1220 = vst.msk [vmem:[%s1932_s29 + $0x70] sm:$0xff] %vm365_vm0, %v1204_v34 }
 0x16d   : > { %v1179_v16 = vadd.f32 %v1543_v17, %v1178_v26 }
 0x16f   : > { %v1183_v39 = vsel %vm1182_vm3, %v1543_v17, %v1179_v16 }
 0x170   : > { %v1188_v41 = vsel %vm1185_vm4, %v1187_v35, %v1183_v39 }
 0x171   : > { %v1205_v31 = vmul.f32 %v1188_v41, %v649_v38 }
 0x173   : > { %1221 = vst.msk [vmem:[%s1932_s29 + $0x78] sm:$0xff] %vm365_vm0, %v1205_v31 }
 0x174 PF: > { %s16_s23 = sadd.s32 1, %s1566_s23   ;;  %s2078_s21 = smov %s1562_s22 }
 0x175   : > { %p13_p5 = scmp.ge.s32.totalorder %s16_s23, 4   ;;  %s2079_s22 = smov %s2081_s24 }
 0x177   :  { %15 = sbr.rel (!%p13_p5) target bundleno = 2 (0x2), region = 81 }

</bundles_post_ra>
